<compile_context>
chip_gen: v6e
topology: v6e:2x2x1
jax: 0.10.0
libtpu: 0.0.40
codegen_flags: <defaults>
</compile_context>

<pallas_src>
import functools
import math

import jax
import jax.numpy as jnp
from jax.experimental import pallas as pl
from jax.experimental.pallas import tpu as pltpu


_VMEM_LIMIT_BYTES = 48 * 1024 * 1024     # above every generation's scoped default,
                                         # below v7x's 64 MiB physical VMEM
_BLOCK_BUDGET_BYTES = 32 * 1024 * 1024   # double-buffered blocks fit v5e/v6e/v7x


def _deriv_loss_kernel(pred_ref, targ_ref, w_ref, m_ref, acc_ref, *, slice_rows):
    """Accumulate sum of (sobelx(d)^2 + sobely(d)^2) * weight * mask per block.

    The block is a (block_rows, W) slab where every `slice_rows` rows is an
    independent (H, W) image; row shifts are masked at image boundaries, which
    reproduces F.conv2d's zero padding=1 exactly.
    """

    @pl.when(pl.program_id(1) == 0)
    def _init():
        acc_ref[...] = jnp.zeros_like(acc_ref)

    # Sobel is linear: run it once on the difference.
    d = pred_ref[...].astype(jnp.float32) - targ_ref[...].astype(jnp.float32)
    rows, cols = d.shape

    row_all = jax.lax.broadcasted_iota(jnp.int32, (rows, cols), 0)
    row = row_all % slice_rows                     # row index within its image
    col = jax.lax.broadcasted_iota(jnp.int32, (rows, cols), 1)

    def shift_rows(x, s):
        # out[i, j] = x[i + s, j] within each image, zero-filled (s in {-1, +1}).
        y = pltpu.roll(x, (-s) % rows, 0)
        valid = (row < slice_rows - s) if s > 0 else (row >= -s)
        return jnp.where(valid, y, 0.0)

    def shift_cols(x, t):
        # out[i, j] = x[i, j + t], zero-filled (t in {-1, +1}).
        y = pltpu.roll(x, (-t) % cols, 1)
        valid = (col < cols - t) if t > 0 else (col >= -t)
        return jnp.where(valid, y, 0.0)

    # Separable 3x3 Sobel (cross-correlation, matching F.conv2d, padding=1).
    sv = shift_rows(d, -1) + 2.0 * d + shift_rows(d, 1)   # [1, 2, 1] vertical
    sh = shift_cols(d, -1) + 2.0 * d + shift_cols(d, 1)   # [1, 2, 1] horizontal
    gx = shift_cols(sv, 1) - shift_cols(sv, -1)   # sobelx = [[-1,0,1],[-2,0,2],[-1,0,1]]
    gy = shift_rows(sh, 1) - shift_rows(sh, -1)   # sobely = [[-1,-2,-1],[0,0,0],[1,2,1]]

    w = w_ref[...].astype(jnp.float32)
    m = m_ref[...].astype(jnp.float32)
    # NOTE: the torch code's /5.0 per element is folded into a single 1/25 scale
    # in the wrapper; its diff_x/diff_y naming swap is irrelevant to the summed
    # loss (squares of both gradients are added) — do not "fix" it here.
    acc_ref[...] += (gx * gx + gy * gy) * (w * m)


def derivative_loss(prediction, target, weight, mask, *, block_slices=None):
    """Pallas TPU forward of DerivativeLoss."""
    N, C, H, W = prediction.shape
    NC = N * C

    # Keep native dtypes in HBM; mask travels as 1 byte; cast to f32 in VMEM.
    pred2 = prediction.reshape(NC * H, W)
    targ2 = target.reshape(NC * H, W)
    w2 = weight.reshape(NC * H, W)
    m2 = mask.reshape(NC * H, W).astype(jnp.int8)

    # Mask count as a trivial XLA reduce over 1-byte data (overlaps the kernel).
    count = jnp.sum(mask, dtype=jnp.float32)

    # --- tiling -------------------------------------------------------------
    num_cores = 2 if NC >= 2 else 1   # megacore split; harmless on 1-core parts
    if block_slices is None:
        bytes_per_row = W * (pred2.dtype.itemsize + targ2.dtype.itemsize
                             + w2.dtype.itemsize + m2.dtype.itemsize + 4)  # +f32 acc
        max_rows = max(H, _BLOCK_BUDGET_BYTES // (2 * bytes_per_row))
        block_slices = max(1, max_rows // H)
    block_slices = max(1, min(block_slices, pl.cdiv(NC, num_cores)))
    # Keep block rows a multiple of 32 (safe sublane tile for f32/bf16/int8).
    align = 32 // math.gcd(H, 32)
    block_slices = max(align, (block_slices // align) * align)

    steps = pl.cdiv(NC, num_cores * block_slices)
    nc_pad = num_cores * block_slices * steps
    if nc_pad != NC:
        pad = ((0, (nc_pad - NC) * H), (0, 0))
        pred2 = jnp.pad(pred2, pad)
        targ2 = jnp.pad(targ2, pad)
        w2 = jnp.pad(w2, pad)
        m2 = jnp.pad(m2, pad)      # zero mask => padded rows contribute nothing

    block_rows = block_slices * H
    in_spec = pl.BlockSpec((block_rows, W), lambda p, i: (p * steps + i, 0))
    out_spec = pl.BlockSpec((block_rows, W), lambda p, i: (p, 0))

    acc = pl.pallas_call(
        functools.partial(_deriv_loss_kernel, slice_rows=H),
        grid=(num_cores, steps),
        in_specs=[in_spec, in_spec, in_spec, in_spec],
        out_specs=out_spec,
        out_shape=jax.ShapeDtypeStruct((num_cores * block_rows, W), jnp.float32),
        compiler_params=pltpu.CompilerParams(
            dimension_semantics=("parallel", "arbitrary"),
            vmem_limit_bytes=_VMEM_LIMIT_BYTES),
    )(pred2, targ2, w2, m2)

    # Final cross-lane reduce + folded (1/5)^2 scale + masked mean.
    # (Same as torch: NaN if the mask is empty.)
    return jnp.sum(acc) / (25.0 * count)


def _reference(prediction, target, weight, mask):
    """Plain-JAX reference mirroring the torch forward."""
    C = prediction.shape[1]
    kx = jnp.array([[-1.0, 0.0, 1.0], [-2.0, 0.0, 2.0], [-1.0, 0.0, 1.0]], jnp.float32)
    ky = jnp.array([[-1.0, -2.0, -1.0], [0.0, 0.0, 0.0], [1.0, 2.0, 1.0]], jnp.float32)

    def dconv(x, k):
        kern = jnp.broadcast_to(k[None, None], (C, 1, 3, 3))
        return jax.lax.conv_general_dilated(
            x, kern, (1, 1), ((1, 1), (1, 1)),
            dimension_numbers=("NCHW", "OIHW", "NCHW"),
            feature_group_count=C)

    p_dy, p_dx = dconv(prediction, ky), dconv(prediction, kx)
    t_dy, t_dx = dconv(target, ky), dconv(target, kx)
    diff_x = (p_dy - t_dy) / 5.0
    diff_y = (p_dx - t_dx) / 5.0
    l_total = diff_x * diff_x + diff_y * diff_y
    m = mask.astype(jnp.float32)
    return jnp.sum(l_total * weight * m) / jnp.sum(m)


if __name__ == "__main__":
    key = jax.random.PRNGKey(0)
    k1, k2, k3, k4 = jax.random.split(key, 4)
    N, C, H, W = 2, 4, 16, 128  # lane-friendly spatial width

    prediction = jax.random.normal(k1, (N, C, H, W), jnp.float32)
    target = jax.random.normal(k2, (N, C, H, W), jnp.float32)
    weight = jax.random.uniform(k3, (N, C, H, W), jnp.float32)
    mask = jax.random.bernoulli(k4, 0.5, (N, C, H, W))

    ref = _reference(prediction, target, weight, mask)

    # Auto block sizing (one big block per core at this size).
    loss_auto = derivative_loss(prediction, target, weight, mask)
    jax.block_until_ready(loss_auto)
    # Forced small blocks: exercises multi-step accumulation on the inner axis.
    loss_small = derivative_loss(prediction, target, weight, mask, block_slices=2)
    jax.block_until_ready(loss_small)

    assert jnp.allclose(loss_auto, ref, rtol=1e-4, atol=1e-5), (loss_auto, ref)
    assert jnp.allclose(loss_small, ref, rtol=1e-4, atol=1e-5), (loss_small, ref)

    print("KERNEL_OK")
</pallas_src>

<mosaic_0001>
module attributes {stable_mosaic.version = 11 : i64} {
  func.func @_deriv_loss_kernel(%arg0: i32, %arg1: i32, %arg2: memref<64x128xf32, #tpu.memory_space<vmem>>, %arg3: memref<64x128xf32, #tpu.memory_space<vmem>>, %arg4: memref<64x128xf32, #tpu.memory_space<vmem>>, %arg5: memref<64x128xi8, #tpu.memory_space<vmem>>, %arg6: memref<64x128xf32, #tpu.memory_space<vmem>>) attributes {dimension_semantics = [#tpu.dimension_semantics<parallel>, #tpu.dimension_semantics<arbitrary>], iteration_bounds = array<i64: 2, 1>, scalar_prefetch = 0 : i64, scratch_operands = 0 : i64, tpu.core_type = #tpu.core_type<tc>, window_params = [{transform_indices = @transform_0, window_bounds = array<i64: 64, 128>}, {transform_indices = @transform_1, window_bounds = array<i64: 64, 128>}, {transform_indices = @transform_2, window_bounds = array<i64: 64, 128>}, {transform_indices = @transform_3, window_bounds = array<i64: 64, 128>}, {transform_indices = @transform_4, window_bounds = array<i64: 64, 128>}]} {
    %c0_i32 = arith.constant 0 : i32
    %0 = arith.cmpi eq, %arg1, %c0_i32 : i32
    %1 = arith.extui %0 : i1 to i32
    %c0_i32_0 = arith.constant 0 : i32
    %2 = arith.cmpi ne, %1, %c0_i32_0 : i32
    scf.if %2 {
      %cst_38 = arith.constant 0.000000e+00 : f32
      %85 = vector.broadcast %cst_38 : f32 to vector<64x128xf32>
      %c0_39 = arith.constant 0 : index
      %c0_40 = arith.constant 0 : index
      %86 = vector.load %arg6[%c0_39, %c0_40] : memref<64x128xf32, #tpu.memory_space<vmem>>, vector<64x128xf32>
      tpu.vector_store %arg6[%c0_39, %c0_40], %85 {strides = array<i32>} : memref<64x128xf32, #tpu.memory_space<vmem>>, vector<64x128xf32>,
    } else {
    }
    %c0 = arith.constant 0 : index
    %c0_1 = arith.constant 0 : index
    %3 = vector.load %arg2[%c0, %c0_1] : memref<64x128xf32, #tpu.memory_space<vmem>>, vector<64x128xf32>
    %c0_2 = arith.constant 0 : index
    %c0_3 = arith.constant 0 : index
    %4 = vector.load %arg3[%c0_2, %c0_3] : memref<64x128xf32, #tpu.memory_space<vmem>>, vector<64x128xf32>
    %5 = arith.subf %3, %4 : vector<64x128xf32>
    %6 = tpu.iota {dimensions = array<i32: 0>} : vector<64x128xi32>
    %c16_i32 = arith.constant 16 : i32
    %c0_i32_4 = arith.constant 0 : i32
    %7 = arith.cmpi eq, %c16_i32, %c0_i32_4 : i32
    %c1_i32 = arith.constant 1 : i32
    %8 = arith.select %7, %c1_i32, %c16_i32 : i32
    %9 = vector.broadcast %8 : i32 to vector<64x128xi32>
    %10 = arith.remsi %6, %9 : vector<64x128xi32>
    %c0_i32_5 = arith.constant 0 : i32
    %11 = vector.broadcast %c0_i32_5 : i32 to vector<64x128xi32>
    %12 = arith.cmpi ne, %10, %11 : vector<64x128xi32>
    %c0_i32_6 = arith.constant 0 : i32
    %13 = vector.broadcast %c0_i32_6 : i32 to vector<64x128xi32>
    %14 = arith.cmpi slt, %10, %13 : vector<64x128xi32>
    %c0_i32_7 = arith.constant 0 : i32
    %15 = arith.cmpi slt, %8, %c0_i32_7 : i32
    %16 = vector.broadcast %15 : i1 to vector<64x128xi1>
    %17 = vector.broadcast %16 : vector<64x128xi1> to vector<64x128xi1>
    %18 = arith.xori %14, %17 : vector<64x128xi1>
    %19 = arith.andi %18, %12 : vector<64x128xi1>
    %20 = vector.broadcast %8 : i32 to vector<64x128xi32>
    %21 = arith.addi %10, %20 : vector<64x128xi32>
    %22 = arith.select %19, %21, %10 : vector<64x128xi1>, vector<64x128xi32>
    %23 = tpu.iota {dimensions = array<i32: 1>} : vector<64x128xi32>
    %c1_i32_8 = arith.constant 1 : i32
    %24 = tpu.dynamic_rotate %5 by %c1_i32_8 dim 0 : vector<64x128xf32>, i32 -> vector<64x128xf32>
    %c1_i32_9 = arith.constant 1 : i32
    %25 = vector.broadcast %c1_i32_9 : i32 to vector<64x128xi32>
    %26 = arith.cmpi sge, %22, %25 : vector<64x128xi32>
    %cst = arith.constant 0.000000e+00 : f32
    %27 = vector.broadcast %cst : f32 to vector<64x128xf32>
    %28 = arith.select %26, %24, %27 : vector<64x128xi1>, vector<64x128xf32>
    %cst_10 = arith.constant 2.000000e+00 : f32
    %29 = vector.broadcast %cst_10 : f32 to vector<64x128xf32>
    %30 = arith.mulf %29, %5 : vector<64x128xf32>
    %31 = arith.addf %28, %30 : vector<64x128xf32>
    %c63_i32 = arith.constant 63 : i32
    %32 = tpu.dynamic_rotate %5 by %c63_i32 dim 0 : vector<64x128xf32>, i32 -> vector<64x128xf32>
    %c15_i32 = arith.constant 15 : i32
    %33 = vector.broadcast %c15_i32 : i32 to vector<64x128xi32>
    %34 = arith.cmpi slt, %22, %33 : vector<64x128xi32>
    %cst_11 = arith.constant 0.000000e+00 : f32
    %35 = vector.broadcast %cst_11 : f32 to vector<64x128xf32>
    %36 = arith.select %34, %32, %35 : vector<64x128xi1>, vector<64x128xf32>
    %37 = arith.addf %31, %36 : vector<64x128xf32>
    %c1_i32_12 = arith.constant 1 : i32
    %38 = tpu.dynamic_rotate %5 by %c1_i32_12 dim 1 : vector<64x128xf32>, i32 -> vector<64x128xf32>
    %c1_i32_13 = arith.constant 1 : i32
    %39 = vector.broadcast %c1_i32_13 : i32 to vector<64x128xi32>
    %40 = arith.cmpi sge, %23, %39 : vector<64x128xi32>
    %cst_14 = arith.constant 0.000000e+00 : f32
    %41 = vector.broadcast %cst_14 : f32 to vector<64x128xf32>
    %42 = arith.select %40, %38, %41 : vector<64x128xi1>, vector<64x128xf32>
    %cst_15 = arith.constant 2.000000e+00 : f32
    %43 = vector.broadcast %cst_15 : f32 to vector<64x128xf32>
    %44 = arith.mulf %43, %5 : vector<64x128xf32>
    %45 = arith.addf %42, %44 : vector<64x128xf32>
    %c127_i32 = arith.constant 127 : i32
    %46 = tpu.dynamic_rotate %5 by %c127_i32 dim 1 : vector<64x128xf32>, i32 -> vector<64x128xf32>
    %c127_i32_16 = arith.constant 127 : i32
    %47 = vector.broadcast %c127_i32_16 : i32 to vector<64x128xi32>
    %48 = arith.cmpi slt, %23, %47 : vector<64x128xi32>
    %cst_17 = arith.constant 0.000000e+00 : f32
    %49 = vector.broadcast %cst_17 : f32 to vector<64x128xf32>
    %50 = arith.select %48, %46, %49 : vector<64x128xi1>, vector<64x128xf32>
    %51 = arith.addf %45, %50 : vector<64x128xf32>
    %c127_i32_18 = arith.constant 127 : i32
    %52 = tpu.dynamic_rotate %37 by %c127_i32_18 dim 1 : vector<64x128xf32>, i32 -> vector<64x128xf32>
    %c127_i32_19 = arith.constant 127 : i32
    %53 = vector.broadcast %c127_i32_19 : i32 to vector<64x128xi32>
    %54 = arith.cmpi slt, %23, %53 : vector<64x128xi32>
    %cst_20 = arith.constant 0.000000e+00 : f32
    %55 = vector.broadcast %cst_20 : f32 to vector<64x128xf32>
    %56 = arith.select %54, %52, %55 : vector<64x128xi1>, vector<64x128xf32>
    %c1_i32_21 = arith.constant 1 : i32
    %57 = tpu.dynamic_rotate %37 by %c1_i32_21 dim 1 : vector<64x128xf32>, i32 -> vector<64x128xf32>
    %c1_i32_22 = arith.constant 1 : i32
    %58 = vector.broadcast %c1_i32_22 : i32 to vector<64x128xi32>
    %59 = arith.cmpi sge, %23, %58 : vector<64x128xi32>
    %cst_23 = arith.constant 0.000000e+00 : f32
    %60 = vector.broadcast %cst_23 : f32 to vector<64x128xf32>
    %61 = arith.select %59, %57, %60 : vector<64x128xi1>, vector<64x128xf32>
    %62 = arith.subf %56, %61 : vector<64x128xf32>
    %c63_i32_24 = arith.constant 63 : i32
    %63 = tpu.dynamic_rotate %51 by %c63_i32_24 dim 0 : vector<64x128xf32>, i32 -> vector<64x128xf32>
    %c15_i32_25 = arith.constant 15 : i32
    %64 = vector.broadcast %c15_i32_25 : i32 to vector<64x128xi32>
    %65 = arith.cmpi slt, %22, %64 : vector<64x128xi32>
    %cst_26 = arith.constant 0.000000e+00 : f32
    %66 = vector.broadcast %cst_26 : f32 to vector<64x128xf32>
    %67 = arith.select %65, %63, %66 : vector<64x128xi1>, vector<64x128xf32>
    %c1_i32_27 = arith.constant 1 : i32
    %68 = tpu.dynamic_rotate %51 by %c1_i32_27 dim 0 : vector<64x128xf32>, i32 -> vector<64x128xf32>
    %c1_i32_28 = arith.constant 1 : i32
    %69 = vector.broadcast %c1_i32_28 : i32 to vector<64x128xi32>
    %70 = arith.cmpi sge, %22, %69 : vector<64x128xi32>
    %cst_29 = arith.constant 0.000000e+00 : f32
    %71 = vector.broadcast %cst_29 : f32 to vector<64x128xf32>
    %72 = arith.select %70, %68, %71 : vector<64x128xi1>, vector<64x128xf32>
    %73 = arith.subf %67, %72 : vector<64x128xf32>
    %c0_30 = arith.constant 0 : index
    %c0_31 = arith.constant 0 : index
    %74 = vector.load %arg4[%c0_30, %c0_31] : memref<64x128xf32, #tpu.memory_space<vmem>>, vector<64x128xf32>
    %c0_32 = arith.constant 0 : index
    %c0_33 = arith.constant 0 : index
    %75 = vector.load %arg5[%c0_32, %c0_33] : memref<64x128xi8, #tpu.memory_space<vmem>>, vector<64x128xi8>
    %76 = arith.sitofp %75 : vector<64x128xi8> to vector<64x128xf32>
    %c0_34 = arith.constant 0 : index
    %c0_35 = arith.constant 0 : index
    %77 = vector.load %arg6[%c0_34, %c0_35] : memref<64x128xf32, #tpu.memory_space<vmem>>, vector<64x128xf32>
    %78 = arith.mulf %62, %62 : vector<64x128xf32>
    %79 = arith.mulf %73, %73 : vector<64x128xf32>
    %80 = arith.addf %78, %79 : vector<64x128xf32>
    %81 = arith.mulf %74, %76 : vector<64x128xf32>
    %82 = arith.mulf %80, %81 : vector<64x128xf32>
    %83 = arith.addf %77, %82 : vector<64x128xf32>
    %c0_36 = arith.constant 0 : index
    %c0_37 = arith.constant 0 : index
    %84 = vector.load %arg6[%c0_36, %c0_37] : memref<64x128xf32, #tpu.memory_space<vmem>>, vector<64x128xf32>
    tpu.vector_store %arg6[%c0_36, %c0_37], %83 {strides = array<i32>} : memref<64x128xf32, #tpu.memory_space<vmem>>, vector<64x128xf32>,
    return
  }
  func.func @transform_0(%arg0: i32, %arg1: i32) -> (i32, i32) {
    %c1_i32 = arith.constant 1 : i32
    %0 = arith.muli %arg0, %c1_i32 : i32
    %1 = arith.addi %0, %arg1 : i32
    %c0_i32 = arith.constant 0 : i32
    %c0_i32_0 = arith.constant 0 : i32
    return %1, %c0_i32 : i32, i32
  }
  func.func @transform_1(%arg0: i32, %arg1: i32) -> (i32, i32) {
    %c1_i32 = arith.constant 1 : i32
    %0 = arith.muli %arg0, %c1_i32 : i32
    %1 = arith.addi %0, %arg1 : i32
    %c0_i32 = arith.constant 0 : i32
    %c0_i32_0 = arith.constant 0 : i32
    return %1, %c0_i32 : i32, i32
  }
  func.func @transform_2(%arg0: i32, %arg1: i32) -> (i32, i32) {
    %c1_i32 = arith.constant 1 : i32
    %0 = arith.muli %arg0, %c1_i32 : i32
    %1 = arith.addi %0, %arg1 : i32
    %c0_i32 = arith.constant 0 : i32
    %c0_i32_0 = arith.constant 0 : i32
    return %1, %c0_i32 : i32, i32
  }
  func.func @transform_3(%arg0: i32, %arg1: i32) -> (i32, i32) {
    %c1_i32 = arith.constant 1 : i32
    %0 = arith.muli %arg0, %c1_i32 : i32
    %1 = arith.addi %0, %arg1 : i32
    %c0_i32 = arith.constant 0 : i32
    %c0_i32_0 = arith.constant 0 : i32
    return %1, %c0_i32 : i32, i32
  }
  func.func @transform_4(%arg0: i32, %arg1: i32) -> (i32, i32) {
    %c0_i32 = arith.constant 0 : i32
    %c0_i32_0 = arith.constant 0 : i32
    return %arg0, %c0_i32 : i32, i32
  }
}

</mosaic_0001>

<bundles_post_ra>
// kernel: tpu_custom_call.1
= control target key start
LH: loop header
LB: loop body
LE: loop exit
PB: predicated region body
PF: predicated region fallthrough
CT: control target
= control target key end

     0   :  { %s2109_s0 = inlined_call_operand.hbm [shape: f32[128,128], index: 0, kind: input, shape index: {}]   ;;  %s2110_s1 = inlined_call_operand.hbm [shape: f32[128,128], index: 1, kind: input, shape index: {}]   ;;  %s2111_s2 = inlined_call_operand.hbm [shape: f32[128,128], index: 2, kind: input, shape index: {}]   ;;  %s2112_s3 = inlined_call_operand.hbm [shape: s8[128,128], index: 3, kind: input, shape index: {}]   ;;  %s2113_s4 = inlined_call_operand.hbm [shape: f32[128,128], index: 4, kind: output, shape index: {}]  }
   0x1   :  { %2120 = sst [smem:[#allocation20_spill]] %s2110_s1 }
   0x2   :  { %9 = vsyncpa [#allocation3], 0 }
   0x3   :  { %11 = vsyncpa [#allocation3 + $0x1], 0 }
   0x4   :  { %12 = vsyncpa [#allocation6], 0 }
   0x5   :  { %14 = vsyncpa [#allocation6 + $0x1], 0 }
   0x6   :  { %15 = vsyncpa [#allocation9], 0 }
   0x7   :  { %17 = vsyncpa [#allocation9 + $0x1], 0 }
   0x8   :  { %18 = vsyncpa [#allocation4], 0 }
   0x9   :  { %20 = vsyncpa [#allocation4 + $0x1], 0  ;;  %s1386_s15 = smov 0   ;;  %s1388_s16 = smov 0  }
   0xa   :  { %s1390_s17 = smov 0   ;;  %s1392_s18 = smov 0  }
   0xb   :  { %s1394_s19 = smov 0   ;;  %s1396_s20 = smov 0  }
   0xc LB: > { %2121 = sst [smem:[#allocation15_spill]] %s1328_s15  ;;  %s1417_s21 = sadd.s32 4294967295, %s1348_s20   ;;  %s1348_s20 = sphi %s1396_s20, %s26_s20   ;;  %s1344_s19 = sphi %s1394_s19, %s2159_s19   ;;  %s1340_s18 = sphi %s1392_s18, %s2158_s18   ;;  %s1336_s17 = sphi %s1390_s17, %s2154_s17   ;;  %s1332_s16 = sphi %s1388_s16, %s2157_s16   ;;  %s1328_s15 = sphi %s1386_s15, %s2156_s15  }
   0xd   : > { %2122 = sst [smem:[#allocation16_spill]] %s1336_s17  ;;  %s1033_s22 = sadd.s32 4294967294, %s1348_s20  }
   0xe   : > { %s38_s23 = sadd.s32 1, %s1344_s19  ;;  %s47_s24 = sadd.s32 1, %s1336_s17 }
   0xf   : > { %p40_p0 = scmp.ge.s32.totalorder %s38_s23, 2  ;;  %p54_p1 = scmp.ne.s32.totalorder %s1336_s17, %s1332_s16 }
  0x10   : > { %p55_p2 = scmp.eq.s32.totalorder %s1348_s20, 0  ;;  %p60_p3 = scmp.ne.s32.totalorder %s1332_s16, %s1328_s15 }
  0x11   : > { %s2161_s23 = smov (%p40_p0, %s38_s23), 0  ;;  %p61_p5 = scmp.eq.s32.totalorder %s1417_s21, 0 }
  0x12   : > { %2123 = sst [smem:[#allocation17_spill]] %s2161_s23  ;;  %p1429_p4 = por %p55_p2, %p54_p1 }
  0x13   : > { %s44_s26 = ssub.s32 %s1344_s19, %s2161_s23  ;;  %p168_p6 = scmp.eq.s32.totalorder %s1417_s21, 1 }
  0x14   : > { %p45_p7 = scmp.eq.s32.totalorder %s44_s26, 0  ;;  %p1437_p8 = por %p61_p5, %p60_p3 }
  0x15   : > { %p1441_p9 = por %p168_p6, %p54_p1  ;;  %p174_p10 = scmp.eq.s32.totalorder %s1033_s22, 1 }
  0x16   : > { %s1446_s29 = scalar_select %p45_p7, %s1336_s17, %s47_s24  }
  0x17   : > { %p1448_p11 = por %p174_p10, %p60_p3  ;;  %p1091_p13 = scmp.lt.s32.totalorder %s1348_s20, 2 }
  0x18   : > { %2127 = sst [smem:[#allocation18_spill]] %s1446_s29  ;;  %s1455_s5 = sand.u32 1, %s1336_s17  }
  0x19   : > { %s2128_s30 = scalar_select %p1448_p11, 1, 0 }
  0x1a   : > { %s1458_s6 = sshll.u32 %s1455_s5, 6  ;;  %s1461_s7 = sshll.u32 %s1344_s19, 10 }
  0x1b   : > { %2129 = sst [smem:[#allocation19_spill]] %s2128_s30  ;;  %p1465_p0 = pnand %p1091_p13, %p1429_p4 }
  0x1c   : > { %s216_s9 = sand.u32 1, %s1348_s20   ;;  %s2131_s1 = sld [smem:[#allocation20_spill]] }
  0x1d   : > { %s220_s13 = scalar_lea.vmem [#allocation5], %s1458_s6  ;;  %p1048_p1 = scmp.ge.s32.totalorder %s1348_s20, 1 }
  0x1e   : > { %s228_s14 = sshll.u32 %s220_s13, 4  ;;  %p280_p2 = scmp.lt.s32.totalorder %s1348_s20, 3  ;;  %s229_s14 = int_to_ptr.vmem [resolvable:$true] %s228_s14 }
  0x1f   : > { %s1477_s22 = scalar_lea.sflag [#allocation6], %s216_s9  ;;  %p1150_p3 = pneg %p1465_p0 }
  0x20   : > { %s1161_s24 = scalar_lea.vmem %s229_s14, 1024  ;;  %s1350_s25 = smov [#allocation5]  }
  0x21   : > { %p1162_p4 = scmp.ne.s32.totalorder %s229_s14, %s1161_s24  ;;  %s1166_s26 = sshll.u32 %s1350_s25, 4  ;;  %s1167_s26 = int_to_ptr.vmem [resolvable:$false] %s1166_s26 }
  0x22   : > { %s227_s12 = scalar_lea.hbm %s2131_s1, %s1461_s7  ;;  %s1168_s10 = scalar_lea.vmem %s1167_s26, 2048 }
  0x23   : > { %p1164_p5 = pnand %p1162_p4, %p1150_p3  ;;  %p1169_p7 = scmp.lt.s32.totalorder %s229_s14, %s1167_s26 }
  0x24   : > { %p1170_p10 = scmp.lt.s32.totalorder %s1168_s10, %s1161_s24 }
  0x25   : > { %p1165_p6 = pneg %p1164_p5 }
  0x26   : > { %p1171_p13 = por %p1170_p10, %p1169_p7 }
  0x28   : > { %p1172_p12 = pnand %p1171_p13, %p1165_p6 }
  0x2a   : > { %1175 = shalt.err (!%p1172_p12)
}
  0x2b   : > { %s2118_s11 = smov 128   ;;  %s1352_s9 = smov 8  }
  0x2c   : > { %1080 = dma.hbm_to_vmem [thread:$0]  (!%p1465_p0), %s227_s12, 1024, %s229_s14, %s1477_s22, %s2118_s11, %s2118_s11, %s1352_s9  }
  0x2d   : > { %p1494_p4 = pnand %p1048_p1, %p280_p2  ;;  %s205_s26 = scalar_lea.hbm %s2109_s0, %s1461_s7 }
  0x2e   : > { %s198_s10 = scalar_lea.vmem [#allocation2], %s1458_s6  ;;  %s249_s17 = scalar_lea.hbm %s2111_s2, %s1461_s7 }
  0x2f   : > { %s206_s1 = sshll.u32 %s198_s10, 4  ;;  %s195_s30 = scalar_lea.sflag [#allocation3], %s1455_s5  ;;  %s207_s1 = int_to_ptr.vmem [resolvable:$true] %s206_s1 }
  0x30   : > { %s1189_s15 = scalar_lea.vmem %s207_s1, 1024  ;;  %s1353_s12 = smov [#allocation2]  }
  0x31   : > { %p1190_p12 = scmp.ne.s32.totalorder %s207_s1, %s1189_s15  ;;  %s1194_s14 = sshll.u32 %s1353_s12, 4  ;;  %s1195_s14 = int_to_ptr.vmem [resolvable:$false] %s1194_s14 }
  0x32   : > { %s1196_s11 = scalar_lea.vmem %s1195_s14, 2048  ;;  %p1197_p5 = scmp.lt.s32.totalorder %s207_s1, %s1195_s14 }
  0x33   : > { %p1192_p1 = pnand %p1190_p12, %p1150_p3  ;;  %p1198_p6 = scmp.lt.s32.totalorder %s1196_s11, %s1189_s15 }
  0x35   : > { %p1193_p2 = pneg %p1192_p1  ;;  %p1199_p7 = por %p1198_p6, %p1197_p5 }
  0x37   : > { %p1200_p10 = pnand %p1199_p7, %p1193_p2 }
  0x39   : > { %1203 = shalt.err (!%p1200_p10)
}
  0x3a   : > { %s2133_s23 = smov 128   ;;  %s242_s29 = scalar_lea.vmem [#allocation7], %s1458_s6 }
  0x3b   : > { %1077 = dma.hbm_to_vmem [thread:$0]  (!%p1465_p0), %s205_s26, 1024, %s207_s1, %s195_s30, %s2133_s23, %s2133_s23, %s1352_s9  }
  0x3c   : > { %s250_s24 = sshll.u32 %s242_s29, 4  ;;  %s1045_s25 = sshll.u32 %s1455_s5, 4  ;;  %s251_s24 = int_to_ptr.vmem [resolvable:$true] %s250_s24 }
  0x3d   : > { %s1217_s10 = scalar_lea.vmem %s251_s24, 1024  ;;  %s1354_s15 = smov [#allocation7]  }
  0x3e   : > { %p1218_p13 = scmp.ne.s32.totalorder %s251_s24, %s1217_s10  ;;  %s1222_s11 = sshll.u32 %s1354_s15, 4  ;;  %s1223_s11 = int_to_ptr.vmem [resolvable:$false] %s1222_s11 }
  0x3f   : > { %s1224_s12 = scalar_lea.vmem %s1223_s11, 2048  ;;  %p1225_p2 = scmp.lt.s32.totalorder %s251_s24, %s1223_s11 }
  0x40   : > { %p1220_p12 = pnand %p1218_p13, %p1150_p3  ;;  %p1226_p5 = scmp.lt.s32.totalorder %s1224_s12, %s1217_s10 }
  0x42   : > { %p1221_p1 = pneg %p1220_p12  ;;  %p1227_p6 = por %p1226_p5, %p1225_p2 }
  0x44   : > { %p1228_p7 = pnand %p1227_p6, %p1221_p1 }
  0x46   : > { %1231 = shalt.err (!%p1228_p7)
}
  0x47   : > { %1083 = dma.hbm_to_vmem [thread:$0]  (!%p1465_p0), %s249_s17, 1024, %s251_s24, %s1477_s22, %s2133_s23, %s2133_s23, %s1352_s9  }
  0x48   : > { %s1062_s6 = sshll.u32 %s1344_s19, 8  ;;  %s264_s10 = scalar_lea.vmem [#allocation8], %s1045_s25 }
  0x49   : > { %s271_s29 = scalar_lea.hbm %s2112_s3, %s1062_s6  ;;  %s272_s15 = sshll.u32 %s264_s10, 4  ;;  %s273_s15 = int_to_ptr.vmem [resolvable:$true] %s272_s15 }
  0x4a   : > { %s261_s11 = scalar_lea.sflag [#allocation9], %s1455_s5  ;;  %s1245_s12 = scalar_lea.vmem %s273_s15, 256 }
  0x4b   : > { %p1246_p10 = scmp.ne.s32.totalorder %s273_s15, %s1245_s12  ;;  %s1355_s7 = smov [#allocation8]  }
  0x4c   : > { %s1250_s1 = sshll.u32 %s1355_s7, 4  ;;  %s1251_s1 = int_to_ptr.vmem [resolvable:$false] %s1250_s1 }
  0x4d   : > { %p1248_p13 = pnand %p1246_p10, %p1150_p3  ;;  %s1252_s30 = scalar_lea.vmem %s1251_s1, 512 }
  0x4e   : > { %p1253_p1 = scmp.lt.s32.totalorder %s273_s15, %s1251_s1  ;;  %p1254_p2 = scmp.lt.s32.totalorder %s1252_s30, %s1245_s12 }
  0x4f   : > { %p1249_p12 = pneg %p1248_p13 }
  0x50   : > { %p1255_p5 = por %p1254_p2, %p1253_p1 }
  0x52   : > { %p1256_p6 = pnand %p1255_p5, %p1249_p12 }
  0x54   : > { %1259 = shalt.err (!%p1256_p6)
}
  0x55   : > { %1086 = dma.hbm_to_vmem [thread:$0]  (!%p1465_p0), %s271_s29, 256, %s273_s15, %s261_s11, %s2133_s23, %s2133_s23, %s1352_s9  }
  0x56   : > { %284 = sbr.rel (%p1494_p4) target bundleno = 300 (0x12c), region = 36  ;;  %s1548_s17 = sand.u32 (!%p1494_p4), 1, %s1332_s16  }
  0x57   : > { %s1551_s5 = sshll.u32 (!%p1494_p4), %s1548_s17, 6  ;;  %s287_s22 = scalar_lea.sflag (!%p1494_p4), [#allocation3], %s1548_s17 }
  0x58   : > { %s1555_s24 = scalar_lea.vmem (!%p1494_p4), [#allocation2], %s1551_s5 }
  0x5b   : > { %1311 = dma.done.wait (%p1437_p8), %s287_s22, 1024  }
  0x5c   : > { %1313 = vsyncadd (%p1437_p8), %s287_s22, 4294966272  ;;  %s295_s8 = sand.u32 1, %s1417_s21   ;;  %s1563_s13 = scalar_lea.vmem [#allocation5], %s1551_s5 }
  0x5d   : > { %s296_s9 = scalar_lea.sflag [#allocation6], %s295_s8 }
  0x5e   : > { %1315 = dma.done.wait (%p1437_p8), %s296_s9, 2048  }
  0x5f   : > { %1317 = vsyncadd (%p1437_p8), %s296_s9, 4294965248  ;;  %s1052_s23 = sshll.u32 %s1548_s17, 4  ;;  %s1571_s25 = scalar_lea.vmem [#allocation7], %s1551_s5 }
  0x60   : > { %s314_s6 = scalar_lea.sflag [#allocation9], %s1548_s17  ;;  %s1574_s26 = scalar_lea.vmem [#allocation8], %s1052_s23 }
  0x61   : > { %1319 = dma.done.wait (%p1437_p8), %s314_s6, 256  }
  0x62   : > { %1321 = vsyncadd (%p1437_p8), %s314_s6, 4294967040  ;;  %v380_v0 = vld [vmem:[%s1555_s24 + $0x10] sm:$0xff]  ;;  %v378_v2 = vld [vmem:[%s1555_s24] sm:$0xff]  ;;  %s1356_s21 = smov 1   ;;  %v402_v17 = vlaneseq  ;;  %s1357_s27 = smov 127  }
  0x63   : > { %v388_v1 = vld [vmem:[%s1563_s13 + $0x10] sm:$0xff]  ;;  %v386_v4 = vld [vmem:[%s1563_s13] sm:$0xff]  ;;  %v381_v5 = vld [vmem:[%s1555_s24 + $0x18] sm:$0xff]  ;;  %s2029_s14 = scalar_lea.vmem [#allocation10], %s1551_s5  ;;  %s1063_s29 = sshll.u32 %s1340_s18, 10 }
  0x64   : > { %v1583_v3 = vsub.f32 %v380_v0, %v388_v1  ;;  %v389_v6 = vld [vmem:[%s1563_s13 + $0x18] sm:$0xff]  ;;  %v1588_v7 = vsub.f32 %v378_v2, %v386_v4  ;;  %v379_v8 = vld [vmem:[%s1555_s24 + $0x8] sm:$0xff]  ;;  %v382_v14 = vld [vmem:[%s1555_s24 + $0x20] sm:$0xff]  ;;  %v1621_v24 = vshrl.u32 %v402_v17, 7  ;;  %s881_s10 = sshll.u32 %s2029_s14, 4  ;;  %s2057_s12 = scalar_lea.hbm %s2113_s4, %s1063_s29  ;;  %s2059_s10 = int_to_ptr.vmem [resolvable:$true] %s881_s10 }
  0x65   : > { %v387_v9 = vld [vmem:[%s1563_s13 + $0x8] sm:$0xff]  ;;  %v1594_v10 = vsub.f32 %v381_v5, %v389_v6  ;;  %v390_v15 = vld [vmem:[%s1563_s13 + $0x20] sm:$0xff]  ;;  %v385_v19 = vld [vmem:[%s1555_s24 + $0x38] sm:$0xff]  ;;  %s868_s7 = scalar_lea.sflag [#allocation4], %s1548_s17  ;;  %s1260_s1 = scalar_lea.vmem %s2059_s10, 1024 }
  0x66   : > { %603 = vrot.lane.b32.xlu1 %v1583_v3, %s1356_s21  ;;  %599 = vrot.lane.b32.xlu0 %v1588_v7, %s1356_s21  ;;  %v1598_v11 = vsub.f32 %v379_v8, %v387_v9  ;;  %v383_v12 = vld [vmem:[%s1555_s24 + $0x28] sm:$0xff]  ;;  %v1610_v18 = vsub.f32 %v382_v14, %v390_v15  ;;  %v393_v20 = vld [vmem:[%s1563_s13 + $0x38] sm:$0xff]  ;;  %v404_v26 = vadd.s32 8, %v1621_v24  ;;  %v405_v27 = vadd.s32 16, %v1621_v24  ;;  %p1261_p8 = scmp.ne.s32.totalorder %s2059_s10, %s1260_s1  ;;  %s1358_s18 = smov [#allocation10]  }
  0x67   : > { %v391_v13 = vld [vmem:[%s1563_s13 + $0x28] sm:$0xff]  ;;  %v384_v21 = vld [vmem:[%s1555_s24 + $0x30] sm:$0xff]  ;;  %v1618_v23 = vsub.f32 %v385_v19, %v393_v20  ;;  %v415_v28 = vand.u32 15, %v1621_v24  ;;  %v509_v29 = vrot.slane %v1588_v7, 7  ;;  %v406_v31 = vadd.s32 24, %v1621_v24  ;;  %s1264_s30 = sshll.u32 %s1358_s18, 4  ;;  %s1265_s30 = int_to_ptr.vmem [resolvable:$false] %s1264_s30 }
  0x68   : > { %v1606_v16 = vsub.f32 %v383_v12, %v391_v13  ;;  %v392_v22 = vld [vmem:[%s1563_s13 + $0x30] sm:$0xff]  ;;  %v407_v32 = vadd.s32 32, %v1621_v24  ;;  %vm517_vm0 = vcmp.lt.s32.totalorder %v1621_v24, 1  ;;  %v422_v33 = vand.u32 15, %v404_v26  ;;  %v782_v49 = vld [vmem:[%s1571_s25 + $0x28] sm:$0xff]  ;;  %p1262_p0 = pnand %p1261_p8, %p1441_p9  ;;  %s1266_s5 = scalar_lea.vmem %s1265_s30, 2048 }
  0x69   : > { %v1625_v25 = vsub.f32 %v384_v21, %v392_v22  ;;  %v516_v30 = vrot.slane %v1618_v23, 7  ;;  %v510_v34 = vrot.slane %v1598_v11, 7  ;;  %v429_v35 = vand.u32 15, %v405_v27  ;;  %p1267_p4 = scmp.lt.s32.totalorder %s2059_s10, %s1265_s30  ;;  %p1268_p7 = scmp.lt.s32.totalorder %s1266_s5, %s1260_s1 }
  0x6a   : > { %605 = vrot.lane.b32.xlu1 %v1594_v10, %s1356_s21  ;;  %601 = vrot.lane.b32.xlu0 %v1598_v11, %s1356_s21  ;;  %v559_v36 = vrot.slane %v1598_v11, 1  ;;  %vm566_vm1 = vcmp.lt.s32.totalorder %v1621_v24, 7  ;;  %v560_v37 = vrot.slane %v1583_v3, 1  ;;  %v511_v38 = vrot.slane %v1583_v3, 7  ;;  %p1263_p3 = pneg %p1262_p0 }
  0x6b   : > { %vm1648_vm2 = vcmp.ge.s32.totalorder %v415_v28, 1  ;;  %v408_v40 = vadd.s32 40, %v1621_v24  ;;  %v409_v41 = vadd.s32 48, %v1621_v24  ;;  %v1655_v42 = vadd.s32 56, %v1621_v24  ;;  %p1269_p10 = por %p1268_p7, %p1267_p4 }
  0x6c   : > { %v525_v43 = vsel %vm517_vm0, %v516_v30, %v509_v29  ;;  %v1662_v44 = vmul.f32 2.0, %v1598_v11  ;;  %v436_v45 = vand.u32 15, %v406_v31  ;;  %v443_v46 = vand.u32 15, %v407_v32 }
  0x6d   : > { %v558_v47 = vrot.slane %v1588_v7, 1  ;;  %v524_v48 = vsel %vm517_vm0, %v509_v29, %v510_v34  ;;  %vm1669_vm3 = vcmp.lt.s32.totalorder %v422_v33, 15  ;;  %vm1673_vm4 = vcmp.ge.s32.totalorder %v429_v35, 1  ;;  %p1270_p13 = pnand %p1269_p10, %p1263_p3 }
  0x6e   : > { %609 = vrot.lane.b32.xlu1 %v1606_v16, %s1356_s21  ;;  %607 = vrot.lane.b32.xlu0 %v1610_v18, %s1356_s21  ;;  %v1680_v51 = vmul.f32 2.0, %v1588_v7  ;;  %v572_v52 = vsel %vm566_vm1, %v559_v36, %v560_v37  ;;  %v523_v53 = vsel %vm517_vm0, %v510_v34, %v511_v38  ;;  %v512_v54 = vrot.slane %v1594_v10, 7 }
  0x6f   : > { %v534_v55 = vsel %vm1648_vm2, %v525_v43, 0.0  ;;  %v561_v56 = vrot.slane %v1594_v10, 1  ;;  %v562_v57 = vrot.slane %v1610_v18, 1  ;;  %v513_v58 = vrot.slane %v1610_v18, 7 }
  0x70   : > { %v551_v59 = vadd.f32 %v1662_v44, %v524_v48  ;;  %v1694_v60 = vmul.f32 2.0, %v1583_v3  ;;  %vm1696_vm5 = vcmp.lt.s32.totalorder %v436_v45, 15  ;;  %v450_v62 = vand.u32 15, %v408_v40 }
  0x71   : > { %v573_v63 = vsel %vm566_vm1, %v558_v47, %v559_v36  ;;  %v584_v0 = vsel %vm1669_vm3, %v572_v52, 0.0  ;;  %v536_v1 = vsel %vm1673_vm4, %v523_v53, 0.0  ;;  %v1711_v2 = vmul.f32 2.0, %v1594_v10 }
  0x72   : > { %613 = vrot.lane.b32.xlu1 %v1618_v23, %s1356_s21  ;;  %611 = vrot.lane.b32.xlu0 %v1625_v25, %s1356_s21  ;;  %v522_v4 = vsel %vm517_vm0, %v511_v38, %v512_v54  ;;  %vm1718_vm6 = vcmp.ge.s32.totalorder %v443_v46, 1  ;;  %v514_v6 = vrot.slane %v1606_v16, 7  ;;  %v570_v8 = vsel %vm566_vm1, %v561_v56, %v562_v57 }
  0x73   : > { %v521_v9 = vsel %vm517_vm0, %v512_v54, %v513_v58  ;;  %v592_v12 = vadd.f32 %v584_v0, %v551_v59  ;;  %v571_v13 = vsel %vm566_vm1, %v560_v37, %v561_v56  ;;  %v457_v14 = vand.u32 15, %v409_v41 }
  0x74   : > { %v515_v15 = vrot.slane %v1625_v25, 7  ;;  %v552_v19 = vadd.f32 %v1694_v60, %v536_v1  ;;  %v553_v20 = vadd.f32 %v1711_v2, %v522_v4  ;;  %v1737_v21 = vmul.f32 2.0, %v1610_v18 }
  0x75   : > { %v1740_v22 = vmul.f32 2.0, %v1606_v16  ;;  %v586_v27 = vsel %vm1696_vm5, %v570_v8, 0.0  ;;  %v538_v28 = vsel %vm1718_vm6, %v521_v9, 0.0  ;;  %v520_v29 = vsel %vm517_vm0, %v513_v58, %v514_v6  ;;  %v1816_v9 = vld [vmem:[%s1574_s26] sm:$0xff] }
  0x76   : > { %634 = vrot.lane.b32.xlu1 %v1598_v11, %s1357_s27  ;;  %632 = vrot.lane.b32.xlu0 %v1588_v7, %s1357_s27  ;;  %v564_v11 = vrot.slane %v1625_v25, 1  ;;  %vm1752_vm7 = vcmp.lt.s32.totalorder %v450_v62, 15  ;;  %v464_v32 = vand.u32 15, %v1655_v42  ;;  %v519_v33 = vsel %vm517_vm0, %v514_v6, %v515_v15 }
  0x77   : > { %vm1760_vm8 = vcmp.ge.s32.totalorder %v457_v14, 1  ;;  %v593_v35 = vadd.f32 %v571_v13, %v552_v19  ;;  %v594_v36 = vadd.f32 %v586_v27, %v553_v20  ;;  %v555_v37 = vadd.f32 %v1740_v22, %v520_v29 }
  0x78   : > { %v1767_v38 = vmul.f32 2.0, %v1618_v23  ;;  %v554_v40 = vadd.f32 %v1737_v21, %v538_v28  ;;  %v1774_v42 = vmul.f32 2.0, %v1625_v25  ;;  %v518_v43 = vsel %vm517_vm0, %v515_v15, %v516_v30 }
  0x79   : > { %v540_v46 = vsel %vm1760_vm8, %v519_v33, 0.0  ;;  %vm1788_vm9 = vcmp.lt.s32.totalorder %v464_v32, 15  ;;  %v1813_v4 = vand.u32 127, %v402_v17  ;;  %v788_v14 = vunpack.c.1.s8 %v1816_v9 }
  0x7a   : > { %638 = vrot.lane.b32.xlu1 %v1594_v10, %s1357_s27  ;;  %636 = vrot.lane.b32.xlu0 %v1583_v3, %s1357_s27  ;;  %v550_v3 = vadd.f32 %v1680_v51, %v534_v55  ;;  %v563_v10 = vrot.slane %v1606_v16, 1  ;;  %v556_v53 = vadd.f32 %v1774_v42, %v540_v46  ;;  %v789_v17 = vunpack.c.2.s8 %v1816_v9 }
  0x7b   : > { %vm615_vm10 = vcmp.ge.s32.totalorder %v1813_v4, 1  ;;  %vm648_vm11 = vcmp.lt.s32.totalorder %v1813_v4, 127  ;;  %v796_v33 = vcvt.s32.f32 %v788_v14  ;;  %v790_v46 = vunpack.c.3.s8 %v1816_v9 }
  0x7c   : > { %v591_v26 = vadd.f32 %v573_v63, %v550_v3  ;;  %v569_v45 = vsel %vm566_vm1, %v562_v57, %v563_v10 }
  0x7d   : > { %v595_v30 = vadd.f32 %v569_v45, %v554_v40  ;;  %v797_v40 = vcvt.s32.f32 %v789_v17 }
  0x7e   : > { %642 = vrot.lane.b32.xlu1 %v1606_v16, %s1357_s27  ;;  %640 = vrot.lane.b32.xlu0 %v1610_v18, %s1357_s27  ;;  %v568_v18 = vsel %vm566_vm1, %v563_v10, %v564_v11  ;;  %v565_v16 = vrot.slane %v1618_v23, 1 }
  0x7f   : > { %v588_v41 = vsel %vm1752_vm7, %v568_v18, 0.0 }
  0x80   : > { %v574_v48 = vsel %vm566_vm1, %v565_v16, %v558_v47  ;;  %v567_v47 = vsel %vm566_vm1, %v564_v11, %v565_v16  ;;  %v787_v11 = vunpack.c.0.s8 %v1816_v9  ;;  %v779_v9 = vld [vmem:[%s1571_s25 + $0x10] sm:$0xff] }
  0x81   : > { %v590_v7 = vsel %vm1788_vm9, %v574_v48, 0.0  ;;  %v597_v55 = vadd.f32 %v567_v47, %v556_v53 }
  0x82   : > { %646 = vrot.lane.b32.xlu1 %v1618_v23, %s1357_s27  ;;  %644 = vrot.lane.b32.xlu0 %v1625_v25, %s1357_s27  ;;  %v596_v23 = vadd.f32 %v588_v41, %v555_v37  ;;  %v557_v25 = vadd.f32 %v1767_v38, %v518_v43  ;;  %v795_v28 = vcvt.s32.f32 %v787_v11 }
  0x84   : > { %v598_v54 = vadd.f32 %v590_v7, %v557_v25 }
  0x86   : > { %667 = vrot.lane.b32.xlu1 %v592_v12, %s1357_s27  ;;  %665 = vrot.lane.b32.xlu0 %v591_v26, %s1357_s27 }
  0x8a   : > { %671 = vrot.lane.b32.xlu1 %v594_v36, %s1357_s27  ;;  %669 = vrot.lane.b32.xlu0 %v593_v35, %s1357_s27 }
  0x8e   : > { %675 = vrot.lane.b32.xlu1 %v596_v23, %s1357_s27  ;;  %673 = vrot.lane.b32.xlu0 %v595_v30, %s1357_s27 }
  0x92   : > { %679 = vrot.lane.b32.xlu1 %v598_v54, %s1357_s27  ;;  %677 = vrot.lane.b32.xlu0 %v597_v55, %s1357_s27 }
  0x96   : > { %691 = vrot.lane.b32.xlu1 %v592_v12, %s1356_s21  ;;  %689 = vrot.lane.b32.xlu0 %v591_v26, %s1356_s21 }
  0x9a   : > { %695 = vrot.lane.b32.xlu1 %v594_v36, %s1356_s21  ;;  %693 = vrot.lane.b32.xlu0 %v593_v35, %s1356_s21 }
  0x9e   : > { %699 = vrot.lane.b32.xlu1 %v596_v23, %s1356_s21  ;;  %697 = vrot.lane.b32.xlu0 %v595_v30, %s1356_s21  ;;  %v1856_v30 = vld [vmem:[%s1574_s26 + $0x8] sm:$0xff] }
  0xa2   : > { %703 = vrot.lane.b32.xlu1 %v598_v54, %s1356_s21  ;;  %701 = vrot.lane.b32.xlu0 %v597_v55, %s1356_s21 }
  0xd8   : > { %v604_v56 = vpop.permute.xlu1 %603  ;;  %v600_v57 = vpop.permute.xlu0 %599 }
  0xd9   : > { %v618_v12 = vsel %vm615_vm10, %v604_v56, 0.0  ;;  %v616_v29 = vsel %vm615_vm10, %v600_v57, 0.0 }
  0xda   : > { %v626_v26 = vadd.f32 %v618_v12, %v1694_v60 }
  0xdc   : > { %v606_v58 = vpop.permute.xlu1 %605  ;;  %v602_v59 = vpop.permute.xlu0 %601 }
  0xdd   : > { %v617_v19 = vsel %vm615_vm10, %v602_v59, 0.0  ;;  %v619_v27 = vsel %vm615_vm10, %v606_v58, 0.0  ;;  %v777_v58 = vld [vmem:[%s1571_s25] sm:$0xff] }
  0xde   : > { %v625_v35 = vadd.f32 %v617_v19, %v1662_v44  ;;  %v627_v41 = vadd.f32 %v619_v27, %v1711_v2  ;;  %v624_v44 = vadd.f32 %v616_v29, %v1680_v51  ;;  %v1911_v27 = vmul.f32 %v797_v40, %v779_v9 }
  0xe0   : > { %v610_v62 = vpop.permute.xlu1 %609  ;;  %v608_v63 = vpop.permute.xlu0 %607 }
  0xe1   : > { %v620_v18 = vsel %vm615_vm10, %v608_v63, 0.0  ;;  %v621_v2 = vsel %vm615_vm10, %v610_v62, 0.0  ;;  %v791_v63 = vunpack.c.0.s8 %v1856_v30 }
  0xe2   : > { %v628_v48 = vadd.f32 %v620_v18, %v1737_v21 }
  0xe4   : > { %v614_v0 = vpop.permute.xlu1 %613  ;;  %v612_v1 = vpop.permute.xlu0 %611 }
  0xe5   : > { %v623_v43 = vsel %vm615_vm10, %v614_v0, 0.0  ;;  %v622_v53 = vsel %vm615_vm10, %v612_v1, 0.0  ;;  %v792_v0 = vunpack.c.1.s8 %v1856_v30 }
  0xe6   : > { %v631_v47 = vadd.f32 %v623_v43, %v1767_v38  ;;  %v630_v38 = vadd.f32 %v622_v53, %v1774_v42 }
  0xe8   : > { %v635_v3 = vpop.permute.xlu1 %634  ;;  %v633_v6 = vpop.permute.xlu0 %632 }
  0xe9   : > { %v650_v16 = vsel %vm648_vm11, %v635_v3, 0.0  ;;  %v649_v25 = vsel %vm648_vm11, %v633_v6, 0.0 }
  0xea   : > { %v1851_v23 = vadd.f32 %v650_v16, %v625_v35  ;;  %v1876_v59 = vadd.f32 %v649_v25, %v624_v44  ;;  %v780_v16 = vld [vmem:[%s1571_s25 + $0x18] sm:$0xff]  ;;  %v800_v35 = vcvt.s32.f32 %v792_v0 }
  0xec   : > { %v639_v8 = vpop.permute.xlu1 %638  ;;  %v637_v10 = vpop.permute.xlu0 %636  ;;  %v722_v1 = vrot.slane %v1851_v23, 1  ;;  %v746_v3 = vrot.slane %v1851_v23, 7  ;;  %v794_v23 = vunpack.c.3.s8 %v1856_v30  ;;  %v721_v25 = vrot.slane %v1876_v59, 1 }
  0xed   : > { %v651_v20 = vsel %vm648_vm11, %v637_v10, 0.0  ;;  %v652_v60 = vsel %vm648_vm11, %v639_v8, 0.0  ;;  %v778_v8 = vld [vmem:[%s1571_s25 + $0x8] sm:$0xff]  ;;  %v629_v10 = vadd.f32 %v621_v2, %v1740_v22 }
  0xee   : > { %v1841_v36 = vadd.f32 %v651_v20, %v626_v26  ;;  %v1862_v7 = vadd.f32 %v652_v60, %v627_v41  ;;  %v1909_v26 = vmul.f32 %v796_v33, %v778_v8  ;;  %v793_v41 = vunpack.c.2.s8 %v1856_v30 }
  0xef   : > { %v1960_v8 = vcvt.s32.f32 %v794_v23 }
  0xf0   : > { %v643_v13 = vpop.permute.xlu1 %642  ;;  %v641_v15 = vpop.permute.xlu0 %640  ;;  %v723_v54 = vrot.slane %v1841_v36, 1  ;;  %v747_v55 = vrot.slane %v1841_v36, 7  ;;  %v724_v11 = vrot.slane %v1862_v7, 1  ;;  %v748_v50 = vrot.slane %v1862_v7, 7 }
  0xf1   : > { %v653_v45 = vsel %vm648_vm11, %v641_v15, 0.0  ;;  %v654_v12 = vsel %vm648_vm11, %v643_v13, 0.0  ;;  %v1895_v15 = vmul.f32 %v795_v28, %v777_v58  ;;  %v745_v13 = vrot.slane %v1876_v59, 7 }
  0xf2   : > { %v1871_v56 = vadd.f32 %v653_v45, %v628_v48  ;;  %v734_v42 = vsel %vm566_vm1, %v722_v1, %v723_v54  ;;  %v758_v17 = vsel %vm517_vm0, %v746_v3, %v747_v55  ;;  %v798_v28 = vcvt.s32.f32 %v790_v46  ;;  %v781_v48 = vld [vmem:[%s1571_s25 + $0x20] sm:$0xff] }
  0xf3   : > { %v662_v29 = vadd.f32 %v654_v12, %v629_v10  ;;  %v733_v33 = vsel %vm566_vm1, %v723_v54, %v724_v11  ;;  %v763_v40 = vsel %vm1673_vm4, %v758_v17, 0.0  ;;  %v759_v2 = vsel %vm517_vm0, %v745_v13, %v746_v3 }
  0xf4   : > { %v647_v32 = vpop.permute.xlu1 %646  ;;  %v645_v37 = vpop.permute.xlu0 %644  ;;  %v725_v22 = vrot.slane %v1871_v56, 1  ;;  %v749_v45 = vrot.slane %v1871_v56, 7  ;;  %v1937_v53 = vmul.f32 %v798_v28, %v780_v16  ;;  %v771_v56 = vsub.f32 %v733_v33, %v763_v40 }
  0xf5   : > { %v656_v51 = vsel %vm648_vm11, %v647_v32, 0.0  ;;  %v655_v62 = vsel %vm648_vm11, %v645_v37, 0.0  ;;  %v799_v32 = vcvt.s32.f32 %v791_v63  ;;  %v738_v37 = vsel %vm1669_vm3, %v734_v42, 0.0 }
  0xf6   : > { %v1885_v6 = vadd.f32 %v656_v51, %v631_v47  ;;  %v1904_v19 = vadd.f32 %v655_v62, %v630_v38  ;;  %v732_v43 = vsel %vm566_vm1, %v724_v11, %v725_v22  ;;  %v726_v51 = vrot.slane %v662_v29, 1 }
  0xf7   : > { %v770_v54 = vsub.f32 %v738_v37, %v759_v2  ;;  %v740_v30 = vsel %vm1696_vm5, %v732_v43, 0.0  ;;  %v1947_v59 = vmul.f32 %v799_v32, %v781_v48  ;;  %v1949_v7 = vmul.f32 %v800_v35, %v782_v49 }
  0xf8   : > { %v1866_v21 = vpop.permute.xlu1 %667  ;;  %v1873_v57 = vpop.permute.xlu0 %665  ;;  %v752_v18 = vrot.slane %v1885_v6, 7  ;;  %v727_v46 = vrot.slane %v1904_v19, 1  ;;  %v1951_v62 = vcvt.s32.f32 %v793_v41  ;;  %v756_v63 = vsel %vm517_vm0, %v748_v50, %v749_v45 }
  0xf9   : > { %v728_v0 = vrot.slane %v1885_v6, 1  ;;  %v750_v61 = vrot.slane %v662_v29, 7  ;;  %v751_v9 = vrot.slane %v1904_v19, 7  ;;  %v757_v11 = vsel %vm517_vm0, %v747_v55, %v748_v50 }
  0xfa   : > { %v760_v47 = vsel %vm517_vm0, %v752_v18, %v745_v13  ;;  %v730_v38 = vsel %vm566_vm1, %v726_v51, %v727_v46  ;;  %v735_v12 = vsel %vm566_vm1, %v721_v25, %v722_v1  ;;  %v820_v42 = vmul.f32 %v770_v54, %v770_v54 }
  0xfb   : > { %v761_v10 = vsel %vm1648_vm2, %v760_v47, 0.0  ;;  %v821_v17 = vmul.f32 %v771_v56, %v771_v56  ;;  %v772_v13 = vsub.f32 %v740_v30, %v757_v11  ;;  %v682_v28 = vsel %vm648_vm11, %v1866_v21, 0.0 }
  0xfc   : > { %v1893_v14 = vpop.permute.xlu1 %671  ;;  %v1906_v20 = vpop.permute.xlu0 %669  ;;  %v731_v39 = vsel %vm566_vm1, %v725_v22, %v726_v51  ;;  %v765_v36 = vsel %vm1718_vm6, %v756_v63, 0.0  ;;  %v742_v55 = vsel %vm1752_vm7, %v730_v38, 0.0  ;;  %v736_v1 = vsel %vm566_vm1, %v728_v0, %v721_v25 }
  0xfd   : > { %v681_v19 = vsel %vm648_vm11, %v1873_v57, 0.0  ;;  %v769_v16 = vsub.f32 %v735_v12, %v761_v10  ;;  %v754_v22 = vsel %vm517_vm0, %v750_v61, %v751_v9  ;;  %v755_v35 = vsel %vm517_vm0, %v749_v45, %v750_v61 }
  0xfe   : > { %v822_v33 = vmul.f32 %v772_v13, %v772_v13  ;;  %v773_v40 = vsub.f32 %v731_v39, %v765_v36  ;;  %v774_v41 = vsub.f32 %v742_v55, %v755_v35  ;;  %v683_v57 = vsel %vm648_vm11, %v1906_v20, 0.0 }
  0xff   : > { %v684_v43 = vsel %vm648_vm11, %v1893_v14, 0.0  ;;  %v729_v23 = vsel %vm566_vm1, %v727_v46, %v728_v0  ;;  %v819_v25 = vmul.f32 %v769_v16, %v769_v16  ;;  %v767_v51 = vsel %vm1760_vm8, %v754_v22, 0.0 }
 0x100   : > { %v1915_v60 = vpop.permute.xlu1 %675  ;;  %v1928_v44 = vpop.permute.xlu0 %673  ;;  %v744_v14 = vsel %vm1788_vm9, %v736_v1, 0.0  ;;  %v823_v46 = vmul.f32 %v773_v40, %v773_v40  ;;  %v824_v63 = vmul.f32 %v774_v41, %v774_v41  ;;  %v753_v10 = vsel %vm517_vm0, %v751_v9, %v752_v18  ;;  %v784_v1 = vld [vmem:[%s1571_s25 + $0x38] sm:$0xff] }
 0x101   : > { %v686_v0 = vsel %vm648_vm11, %v1915_v60, 0.0  ;;  %v685_v52 = vsel %vm648_vm11, %v1928_v44, 0.0  ;;  %v775_v18 = vsub.f32 %v729_v23, %v767_v51 }
 0x104   : > { %v1943_v58 = vpop.permute.xlu1 %679  ;;  %v1958_v3 = vpop.permute.xlu0 %677 }
 0x105   : > { %v688_v44 = vsel %vm648_vm11, %v1943_v58, 0.0 }
 0x108   : > { %v692_v29 = vpop.permute.xlu1 %691  ;;  %v690_v32 = vpop.permute.xlu0 %689 }
 0x109   : > { %v706_v21 = vsel %vm615_vm10, %v692_v29, 0.0  ;;  %v705_v5 = vsel %vm615_vm10, %v690_v32, 0.0  ;;  %v776_v29 = vsub.f32 %v744_v14, %v753_v10 }
 0x10a   : > { %v714_v31 = vsub.f32 %v682_v28, %v706_v21  ;;  %v713_v37 = vsub.f32 %v681_v19, %v705_v5 }
 0x10b   : > { %v826_v5 = vmul.f32 %v776_v29, %v776_v29 }
 0x10c   : > { %v812_v48 = vmul.f32 %v714_v31, %v714_v31  ;;  %v696_v49 = vpop.permute.xlu1 %695  ;;  %v811_v50 = vmul.f32 %v713_v37, %v713_v37  ;;  %v694_v45 = vpop.permute.xlu0 %693  ;;  %v842_v31 = vmul.f32 %v1960_v8, %v784_v1  ;;  %v825_v37 = vmul.f32 %v775_v18, %v775_v18 }
 0x10d   : > { %v708_v2 = vsel %vm615_vm10, %v696_v49, 0.0  ;;  %v707_v20 = vsel %vm615_vm10, %v694_v45, 0.0 }
 0x10e   : > { %v828_v47 = vadd.f32 %v820_v42, %v812_v48  ;;  %v716_v54 = vsub.f32 %v684_v43, %v708_v2  ;;  %v827_v56 = vadd.f32 %v819_v25, %v811_v50  ;;  %v715_v30 = vsub.f32 %v683_v57, %v707_v20 }
 0x110   : > { %v844_v38 = vmul.f32 %v1909_v26, %v828_v47  ;;  %v814_v34 = vmul.f32 %v716_v54, %v716_v54  ;;  %v700_v61 = vpop.permute.xlu1 %699  ;;  %v843_v11 = vmul.f32 %v1895_v15, %v827_v56  ;;  %v813_v12 = vmul.f32 %v715_v30, %v715_v30  ;;  %v698_v42 = vpop.permute.xlu0 %697 }
 0x111   : > { %v710_v60 = vsel %vm615_vm10, %v700_v61, 0.0  ;;  %v709_v13 = vsel %vm615_vm10, %v698_v42, 0.0 }
 0x112   : > { %v830_v26 = vadd.f32 %v822_v33, %v814_v34  ;;  %v718_v28 = vsub.f32 %v686_v0, %v710_v60  ;;  %v829_v6 = vadd.f32 %v821_v17, %v813_v12  ;;  %v717_v24 = vsub.f32 %v685_v52, %v709_v13  ;;  %860 = vst [vmem:[%s2029_s14 + $0x8] sm:$0xff] %v844_v38 }
 0x113   : > { %v687_v17 = vsel %vm648_vm11, %v1958_v3, 0.0  ;;  %859 = vst [vmem:[%s2029_s14] sm:$0xff] %v843_v11 }
 0x114   : > { %v846_v15 = vmul.f32 %v1937_v53, %v830_v26  ;;  %v816_v9 = vmul.f32 %v718_v28, %v718_v28  ;;  %v704_v39 = vpop.permute.xlu1 %703  ;;  %v845_v36 = vmul.f32 %v1911_v27, %v829_v6  ;;  %v815_v58 = vmul.f32 %v717_v24, %v717_v24  ;;  %v702_v55 = vpop.permute.xlu0 %701  ;;  %v783_v53 = vld [vmem:[%s1571_s25 + $0x30] sm:$0xff] }
 0x115   : > { %v712_v19 = vsel %vm615_vm10, %v704_v39, 0.0  ;;  %v711_v32 = vsel %vm615_vm10, %v702_v55, 0.0  ;;  %v841_v33 = vmul.f32 %v1951_v62, %v783_v53 }
 0x116   : > { %v832_v16 = vadd.f32 %v824_v63, %v816_v9  ;;  %v720_v21 = vsub.f32 %v688_v44, %v712_v19  ;;  %v831_v22 = vadd.f32 %v823_v46, %v815_v58  ;;  %v719_v3 = vsub.f32 %v687_v17, %v711_v32  ;;  %862 = vst [vmem:[%s2029_s14 + $0x18] sm:$0xff] %v846_v15 }
 0x117   : > { %861 = vst [vmem:[%s2029_s14 + $0x10] sm:$0xff] %v845_v36 }
 0x118   : > { %v848_v27 = vmul.f32 %v1949_v7, %v832_v16  ;;  %v818_v35 = vmul.f32 %v720_v21, %v720_v21  ;;  %v847_v4 = vmul.f32 %v1947_v59, %v831_v22  ;;  %v817_v40 = vmul.f32 %v719_v3, %v719_v3 }
 0x11a   : > { %v834_v41 = vadd.f32 %v826_v5, %v818_v35  ;;  %v833_v57 = vadd.f32 %v825_v37, %v817_v40  ;;  %864 = vst [vmem:[%s2029_s14 + $0x28] sm:$0xff] %v848_v27  ;;  %863 = vst [vmem:[%s2029_s14 + $0x20] sm:$0xff] %v847_v4 }
 0x11c   : > { %v850_v7 = vmul.f32 %v842_v31, %v834_v41  ;;  %v849_v8 = vmul.f32 %v841_v33, %v833_v57 }
 0x11e   : > { %866 = vst [vmem:[%s2029_s14 + $0x38] sm:$0xff] %v850_v7  ;;  %865 = vst [vmem:[%s2029_s14 + $0x30] sm:$0xff] %v849_v8 }
 0x11f   : > { %1273 = shalt.err (!%p1270_p13)
}
 0x120   : > { %s1274_s22 = scalar_lea.hbm %s2057_s12, 1024  ;;  %s1278_s9 = scalar_lea.hbm %s2113_s4, 2048 }
 0x121   : > { %p1275_p12 = scmp.ne.s32.totalorder %s2057_s12, %s1274_s22  ;;  %p1279_p5 = scmp.lt.s32.totalorder %s2057_s12, %s2113_s4 }
 0x122   : > { %p1280_p6 = scmp.lt.s32.totalorder %s1278_s9, %s1274_s22 }
 0x123   : > { %p1276_p1 = pnand %p1275_p12, %p1441_p9 }
 0x124   : > { %p1281_p8 = por %p1280_p6, %p1279_p5 }
 0x125   : > { %p1277_p2 = pneg %p1276_p1 }
 0x127   : > { %p1282_p0 = pnand %p1281_p8, %p1277_p2 }
 0x129   : > { %1285 = shalt.err (!%p1282_p0)
}
 0x12a   : > { %s1359_s25 = smov 128   ;;  %s1360_s6 = smov 8  }
 0x12b   : > { %1072 = dma.vmem_to_hbm [thread:$0]  (%p1441_p9), %s2059_s10, 1024, %s2057_s12, %s868_s7, %s1359_s25, %s1359_s25, %s1360_s6  }
 0x12c PF: > { %s2150_s26 = sld [smem:[#allocation15_spill]]  ;;  %p2152_p3 = scmp.ge.s32.totalorder %s1348_s20, 2 }
 0x12e   : > { %p1088_p4 = pnand %p2152_p3, %p1448_p11 }
 0x130   : > { %p1089_p7 = pneg %p1088_p4 }
 0x132   : > { %s896_s27 = sand.u32 1, %s2150_s26  }
 0x133   : > { %s897_s14 = scalar_lea.sflag [#allocation4], %s896_s27 }
 0x134   : > { %1323 = dma.done.wait (%p1089_p7), %s897_s14, 1024  }
 0x135   : > { %1325 = vsyncadd (%p1089_p7), %s897_s14, 4294966272  ;;  %s26_s20 = sadd.s32 1, %s1348_s20   ;;  %s2153_s29 = sld [smem:[#allocation16_spill]] }
 0x136   : > { %p23_p10 = scmp.ge.s32.totalorder %s26_s20, 4   ;;  %s2154_s17 = sld [smem:[#allocation18_spill]] }
 0x137   : > { %s2155_s28 = sld [smem:[#allocation17_spill]]  ;;  %s2156_s15 = smov %s1332_s16 }
 0x138   : > { %s2158_s18 = smov %s1344_s19 }
 0x139   :  { %25 = sbr.rel (!%p23_p10) target bundleno = 12 (0xc), region = 122 }
 0x13b   : > { %s2157_s16 = smov %s2153_s29 }
 0x13d   : > { %s2159_s19 = smov %s2155_s28 }
 0x13e   :  { %902 = vsyncpa [#allocation3], 1 }
 0x13f   :  { %904 = vsyncpa [#allocation3 + $0x1], 1 }
 0x140   :  { %905 = vsyncpa [#allocation6], 1 }
 0x141   :  { %907 = vsyncpa [#allocation6 + $0x1], 1 }
 0x142   :  { %908 = vsyncpa [#allocation9], 1 }
 0x143   :  { %910 = vsyncpa [#allocation9 + $0x1], 1 }
 0x144   :  { %911 = vsyncpa [#allocation4], 1 }
 0x145   :  { %913 = vsyncpa [#allocation4 + $0x1], 1 }

</bundles_post_ra>
